<compile_context>
chip_gen: v7x
topology: tpu7x:2x2x1
jax: 0.10.0
libtpu: 0.0.40
codegen_flags: <defaults>
</compile_context>

<pallas_src>
import jax
import jax.numpy as jnp
from jax.experimental import pallas as pl
from jax.experimental.pallas import tpu as pltpu

# Logical (PyTorch) sizes
IN_DIM = 100 + 10   # seed + one-hot label
HID = 200
OUT = 784
EPS = 1e-5
NEG_SLOPE = 0.02

# Hardware-padded sizes (lane = 128, sublane = 8)
IN_PAD = 128
HID_PAD = 256


def _round_up(a, m):
    return (a + m - 1) // m * m


def generator_kernel(x_ref, w1_ref, b1_ref, w2_ref, b2_ref, o_ref):
    # ---- Linear(110 -> 200), padded to (128 -> 256), bf16 in, f32 acc ----
    h = jnp.dot(x_ref[...], w1_ref[...],
                preferred_element_type=jnp.float32) + b1_ref[...]   # (TB, 256)

    # ---- LeakyReLU(0.02) ----
    h = jnp.where(h > 0, h, NEG_SLOPE * h)

    # ---- LayerNorm(200), eps=1e-5 (affine folded into w2/b2) ----
    # Padded lanes [200:256] of h are exactly 0 (zero w1 columns / zero b1),
    # so summing the full padded width and dividing by HID=200 is exact.
    inv_n = jnp.float32(1.0 / HID)
    s = jnp.sum(h, axis=-1, keepdims=True)
    ss = jnp.sum(h * h, axis=-1, keepdims=True)
    mean = s * inv_n
    var = jnp.maximum(ss * inv_n - mean * mean, 0.0)   # clamp guards cancellation
    hn = (h - mean) * jax.lax.rsqrt(var + EPS)
    # Padded lanes of hn are (-mean)*rsqrt != 0, but the corresponding w2 rows
    # are zero-padded, so they never leak into the output.

    # ---- Linear(200 -> 784) (gamma/beta pre-folded) + Sigmoid, bf16 out ----
    y = jnp.dot(hn.astype(jnp.bfloat16), w2_ref[...],
                preferred_element_type=jnp.float32) + b2_ref[...]   # (TB, 784)
    o_ref[...] = jax.nn.sigmoid(y).astype(o_ref.dtype)


def generator_forward(seed_tensor, label_tensor, dev_params, *, tile_b=512):
    """seed: (100,) or (B,100); label: (10,) or (B,10) -> (784,) or (B,784) bf16."""
    w1, b1, w2, b2 = dev_params
    single = seed_tensor.ndim == 1
    seeds = jnp.atleast_2d(seed_tensor)
    labels = jnp.atleast_2d(label_tensor)
    B = seeds.shape[0]
    x = jnp.concatenate([seeds, labels], axis=-1).astype(jnp.bfloat16)   # (B, 110)

    # Batch tiling: pad rows to a sublane multiple; for small/medium B split
    # into >=2 tiles so the parallel grid axis engages both v7x TensorCores.
    if B <= tile_b:
        TB = 8 if B <= 8 else max(8, _round_up(-(-B // 2), 8))
    else:
        TB = tile_b
    B_pad = _round_up(B, TB)
    x_pad = jnp.pad(x, ((0, B_pad - B), (0, IN_PAD - IN_DIM)))           # (B_pad, 128)

    grid = (B_pad // TB,)
    const = lambda i: (0, 0)   # weights/biases: DMA once, resident across the grid

    flops = 2 * B_pad * (IN_PAD * HID_PAD + HID_PAD * OUT)
    bytes_accessed = (B_pad * IN_PAD * 2                 # x (bf16)
                      + IN_PAD * HID_PAD * 2 + HID_PAD * 4   # w1 (bf16) + b1 (f32)
                      + HID_PAD * OUT * 2 + OUT * 4          # w2 (bf16) + b2 (f32)
                      + B_pad * OUT * 2)                     # out (bf16)

    out = pl.pallas_call(
        generator_kernel,
        out_shape=jax.ShapeDtypeStruct((B_pad, OUT), jnp.bfloat16),
        grid=grid,
        in_specs=[
            pl.BlockSpec((TB, IN_PAD), lambda i: (i, 0)),        # x tile (bf16)
            pl.BlockSpec((IN_PAD, HID_PAD), const),              # w1 (bf16)
            pl.BlockSpec((1, HID_PAD), const),                   # b1 (f32)
            pl.BlockSpec((HID_PAD, OUT), const),                 # w2' (bf16)
            pl.BlockSpec((1, OUT), const),                       # b2' (f32)
        ],
        out_specs=pl.BlockSpec((TB, OUT), lambda i: (i, 0)),
        compiler_params=pltpu.CompilerParams(
            dimension_semantics=("parallel",)),                  # megacore on v7x
        cost_estimate=pl.CostEstimate(
            flops=flops,
            transcendentals=B_pad * (OUT + 1),
            bytes_accessed=bytes_accessed),
    )(x_pad, w1, b1, w2, b2)

    if B_pad != B:
        out = out[:B]          # cheap row-only slice; no column slice pass
    return out[0] if single else out


def init_params(key):
    """f32 params at natural shapes, mimicking PyTorch nn.Linear default init."""
    k1, k2, k3, k4 = jax.random.split(key, 4)
    lim1 = 1.0 / jnp.sqrt(jnp.float32(IN_DIM))
    lim2 = 1.0 / jnp.sqrt(jnp.float32(HID))
    w1 = jax.random.uniform(k1, (IN_DIM, HID), jnp.float32, -lim1, lim1)
    b1 = jax.random.uniform(k2, (HID,), jnp.float32, -lim1, lim1)
    gamma = jnp.ones((HID,), jnp.float32)
    beta = jnp.zeros((HID,), jnp.float32)
    w2 = jax.random.uniform(k3, (HID, OUT), jnp.float32, -lim2, lim2)
    b2 = jax.random.uniform(k4, (OUT,), jnp.float32, -lim2, lim2)
    return (w1, b1, gamma, beta, w2, b2)


def prepare_params(raw):
    """Fold LayerNorm affine into Linear2, zero-pad to hardware tiles.

    Invariant required by the kernel: padded w1 columns / b1 lanes and padded
    w2 rows must be exactly zero.
    """
    w1, b1, gamma, beta, w2, b2 = raw
    w2f = gamma[:, None] * w2            # (200, 784), exact fold of affine scale
    b2f = beta @ w2 + b2                 # (784,),     exact fold of affine shift
    w1p = jnp.zeros((IN_PAD, HID_PAD), jnp.float32).at[:IN_DIM, :HID].set(w1)
    b1p = jnp.zeros((1, HID_PAD), jnp.float32).at[0, :HID].set(b1)
    w2p = jnp.zeros((HID_PAD, OUT), jnp.float32).at[:HID, :].set(w2f)
    b2p = b2f.reshape(1, OUT).astype(jnp.float32)
    return (w1p.astype(jnp.bfloat16), b1p, w2p.astype(jnp.bfloat16), b2p)


def reference_forward(seed_tensor, label_tensor, raw_params):
    """Pure-JAX f32 reference (matches the PyTorch module)."""
    w1, b1, gamma, beta, w2, b2 = raw_params
    single = seed_tensor.ndim == 1
    x = jnp.concatenate([jnp.atleast_2d(seed_tensor),
                         jnp.atleast_2d(label_tensor)], axis=-1).astype(jnp.float32)
    h = x @ w1 + b1
    h = jnp.where(h > 0, h, NEG_SLOPE * h)
    mean = jnp.mean(h, axis=-1, keepdims=True)
    var = jnp.mean((h - mean) ** 2, axis=-1, keepdims=True)
    h = (h - mean) * jax.lax.rsqrt(var + EPS) * gamma + beta
    y = h @ w2 + b2
    out = jax.nn.sigmoid(y)
    return out[0] if single else out


if __name__ == "__main__":
    key = jax.random.PRNGKey(0)
    kp, ks = jax.random.split(key)
    raw_params = init_params(kp)
    dev_params = prepare_params(raw_params)

    # Batched demo: 16 samples, labels 0..9 cycling (generate_random_seed equiv).
    B = 16
    seeds = jax.random.normal(ks, (B, 100), jnp.float32)
    labels = jax.nn.one_hot(jnp.arange(B) % 10, 10, dtype=jnp.float32)

    out = generator_forward(seeds, labels, dev_params)
    out = jax.block_until_ready(out)
    assert out.shape == (B, OUT), out.shape
    ref = reference_forward(seeds, labels, raw_params)
    err = float(jnp.max(jnp.abs(out.astype(jnp.float32) - ref)))
    assert err < 3e-2, err   # bf16 inputs/weights/output vs f32 reference

    # Single-sample path (original module API: forward(seed[100], label[10])).
    out1 = generator_forward(seeds[0], labels[0], dev_params)
    out1 = jax.block_until_ready(out1)
    assert out1.shape == (OUT,), out1.shape
    err1 = float(jnp.max(jnp.abs(out1.astype(jnp.float32) - ref[0])))
    assert err1 < 3e-2, err1

    print("KERNEL_OK")
</pallas_src>

<mosaic_0001>
module attributes {stable_mosaic.version = 11 : i64} {
  func.func @generator_kernel(%arg0: i32, %arg1: memref<8x128xbf16, #tpu.memory_space<vmem>>, %arg2: memref<128x256xbf16, #tpu.memory_space<vmem>>, %arg3: memref<1x256xf32, #tpu.memory_space<vmem>>, %arg4: memref<256x784xbf16, #tpu.memory_space<vmem>>, %arg5: memref<1x784xf32, #tpu.memory_space<vmem>>, %arg6: memref<8x784xbf16, #tpu.memory_space<vmem>>) attributes {dimension_semantics = [#tpu.dimension_semantics<parallel>], iteration_bounds = array<i64: 2>, scalar_prefetch = 0 : i64, scratch_operands = 0 : i64, tpu.core_type = #tpu.core_type<tc>, window_params = [{transform_indices = @transform_0, window_bounds = array<i64: 8, 128>}, {pipeline_mode = #tpu.pipeline_mode<synchronous>, transform_indices = @transform_1, window_bounds = array<i64: 128, 256>}, {pipeline_mode = #tpu.pipeline_mode<synchronous>, transform_indices = @transform_2, window_bounds = array<i64: 1, 256>}, {pipeline_mode = #tpu.pipeline_mode<synchronous>, transform_indices = @transform_3, window_bounds = array<i64: 256, 784>}, {pipeline_mode = #tpu.pipeline_mode<synchronous>, transform_indices = @transform_4, window_bounds = array<i64: 1, 784>}, {transform_indices = @transform_5, window_bounds = array<i64: 8, 784>}]} {
    %c0 = arith.constant 0 : index
    %c0_0 = arith.constant 0 : index
    %0 = vector.load %arg1[%c0, %c0_0] : memref<8x128xbf16, #tpu.memory_space<vmem>>, vector<8x128xbf16>
    %c0_1 = arith.constant 0 : index
    %c0_2 = arith.constant 0 : index
    %1 = vector.load %arg2[%c0_1, %c0_2] : memref<128x256xbf16, #tpu.memory_space<vmem>>, vector<128x256xbf16>
    %cst = arith.constant dense<0.000000e+00> : vector<8x256xf32>
    %2 = tpu.matmul %0, %1, %cst {dimension_numbers = #tpu.dot_dimension_numbers<[1], [0], [0], [1], [0, 0, 1, 1], [], []>} : vector<8x128xbf16>, vector<128x256xbf16>, vector<8x256xf32> -> vector<8x256xf32>
    %c0_3 = arith.constant 0 : index
    %c0_4 = arith.constant 0 : index
    %3 = vector.load %arg3[%c0_3, %c0_4] : memref<1x256xf32, #tpu.memory_space<vmem>>, vector<1x256xf32>
    %4 = vector.broadcast %3 : vector<1x256xf32> to vector<8x256xf32>
    %5 = arith.addf %2, %4 : vector<8x256xf32>
    %cst_5 = arith.constant 0.000000e+00 : f32
    %6 = vector.broadcast %cst_5 : f32 to vector<8x256xf32>
    %7 = arith.cmpf ogt, %5, %6 : vector<8x256xf32>
    %cst_6 = arith.constant 2.000000e-02 : f32
    %8 = vector.broadcast %cst_6 : f32 to vector<8x256xf32>
    %9 = arith.mulf %8, %5 : vector<8x256xf32>
    %10 = arith.select %7, %5, %9 : vector<8x256xi1>, vector<8x256xf32>
    %cst_7 = arith.constant dense<0.000000e+00> : vector<8xf32>
    %11 = vector.multi_reduction <add>, %10, %cst_7 [1] : vector<8x256xf32> to vector<8xf32>
    %12 = vector.shape_cast %11 : vector<8xf32> to vector<8x1xf32>
    %13 = arith.mulf %10, %10 : vector<8x256xf32>
    %cst_8 = arith.constant dense<0.000000e+00> : vector<8xf32>
    %14 = vector.multi_reduction <add>, %13, %cst_8 [1] : vector<8x256xf32> to vector<8xf32>
    %15 = vector.shape_cast %14 : vector<8xf32> to vector<8x1xf32>
    %cst_9 = arith.constant 5.000000e-03 : f32
    %16 = vector.broadcast %cst_9 : f32 to vector<8x1xf32>
    %17 = arith.mulf %12, %16 : vector<8x1xf32>
    %cst_10 = arith.constant 5.000000e-03 : f32
    %18 = vector.broadcast %cst_10 : f32 to vector<8x1xf32>
    %19 = arith.mulf %15, %18 : vector<8x1xf32>
    %20 = arith.mulf %17, %17 : vector<8x1xf32>
    %21 = arith.subf %19, %20 : vector<8x1xf32>
    %cst_11 = arith.constant 0.000000e+00 : f32
    %22 = vector.broadcast %cst_11 : f32 to vector<8x1xf32>
    %23 = arith.maximumf %21, %22 : vector<8x1xf32>
    %24 = vector.broadcast %17 : vector<8x1xf32> to vector<8x256xf32>
    %25 = arith.subf %10, %24 : vector<8x256xf32>
    %cst_12 = arith.constant 9.99999974E-6 : f32
    %26 = vector.broadcast %cst_12 : f32 to vector<8x1xf32>
    %27 = arith.addf %23, %26 : vector<8x1xf32>
    %28 = math.rsqrt %27 : vector<8x1xf32>
    %29 = vector.broadcast %28 : vector<8x1xf32> to vector<8x256xf32>
    %30 = arith.mulf %25, %29 : vector<8x256xf32>
    %31 = arith.truncf %30 : vector<8x256xf32> to vector<8x256xbf16>
    %c0_13 = arith.constant 0 : index
    %c0_14 = arith.constant 0 : index
    %32 = vector.load %arg4[%c0_13, %c0_14] : memref<256x784xbf16, #tpu.memory_space<vmem>>, vector<256x784xbf16>
    %cst_15 = arith.constant dense<0.000000e+00> : vector<8x784xf32>
    %33 = tpu.matmul %31, %32, %cst_15 {dimension_numbers = #tpu.dot_dimension_numbers<[1], [0], [0], [1], [0, 0, 1, 1], [], []>} : vector<8x256xbf16>, vector<256x784xbf16>, vector<8x784xf32> -> vector<8x784xf32>
    %c0_16 = arith.constant 0 : index
    %c0_17 = arith.constant 0 : index
    %34 = vector.load %arg5[%c0_16, %c0_17] : memref<1x784xf32, #tpu.memory_space<vmem>>, vector<1x784xf32>
    %35 = vector.broadcast %34 : vector<1x784xf32> to vector<8x784xf32>
    %36 = arith.addf %33, %35 : vector<8x784xf32>
    %37 = arith.negf %36 : vector<8x784xf32>
    %38 = math.exp %37 : vector<8x784xf32>
    %cst_18 = arith.constant 1.000000e+00 : f32
    %39 = vector.broadcast %cst_18 : f32 to vector<8x784xf32>
    %40 = arith.addf %39, %38 : vector<8x784xf32>
    %41 = arith.divf %39, %40 : vector<8x784xf32>
    %42 = arith.truncf %41 : vector<8x784xf32> to vector<8x784xbf16>
    %c0_19 = arith.constant 0 : index
    %c0_20 = arith.constant 0 : index
    %43 = vector.load %arg6[%c0_19, %c0_20] : memref<8x784xbf16, #tpu.memory_space<vmem>>, vector<8x784xbf16>
    tpu.vector_store %arg6[%c0_19, %c0_20], %42 {strides = array<i32>} : memref<8x784xbf16, #tpu.memory_space<vmem>>, vector<8x784xbf16>,
    return
  }
  func.func @transform_0(%arg0: i32) -> (i32, i32) {
    %c0_i32 = arith.constant 0 : i32
    %c0_i32_0 = arith.constant 0 : i32
    return %arg0, %c0_i32 : i32, i32
  }
  func.func @transform_1(%arg0: i32) -> (i32, i32) {
    %c0_i32 = arith.constant 0 : i32
    %c0_i32_0 = arith.constant 0 : i32
    %c0_i32_1 = arith.constant 0 : i32
    return %c0_i32, %c0_i32_0 : i32, i32
  }
  func.func @transform_2(%arg0: i32) -> (i32, i32) {
    %c0_i32 = arith.constant 0 : i32
    %c0_i32_0 = arith.constant 0 : i32
    %c0_i32_1 = arith.constant 0 : i32
    return %c0_i32, %c0_i32_0 : i32, i32
  }
  func.func @transform_3(%arg0: i32) -> (i32, i32) {
    %c0_i32 = arith.constant 0 : i32
    %c0_i32_0 = arith.constant 0 : i32
    %c0_i32_1 = arith.constant 0 : i32
    return %c0_i32, %c0_i32_0 : i32, i32
  }
  func.func @transform_4(%arg0: i32) -> (i32, i32) {
    %c0_i32 = arith.constant 0 : i32
    %c0_i32_0 = arith.constant 0 : i32
    %c0_i32_1 = arith.constant 0 : i32
    return %c0_i32, %c0_i32_0 : i32, i32
  }
  func.func @transform_5(%arg0: i32) -> (i32, i32) {
    %c0_i32 = arith.constant 0 : i32
    %c0_i32_0 = arith.constant 0 : i32
    return %arg0, %c0_i32 : i32, i32
  }
}

</mosaic_0001>

<bundles_post_ra>
// kernel: tpu_custom_call.1
= control target key start
LH: loop header
LB: loop body
LE: loop exit
PB: predicated region body
PF: predicated region fallthrough
CT: control target
= control target key end

     0   :  { %10 = vsyncpa [#allocation3], 0  ;;  %s2522_s0 = inlined_call_operand.vmem [shape: bf16[16,128], index: 0, kind: input, shape index: {}]   ;;  %s2523_s1 = inlined_call_operand.vmem [shape: bf16[128,256], index: 1, kind: input, shape index: {}]   ;;  %s2524_s2 = inlined_call_operand.vmem [shape: f32[1,256], index: 2, kind: input, shape index: {}]   ;;  %s2525_s3 = inlined_call_operand.vmem [shape: bf16[256,784], index: 3, kind: input, shape index: {}]   ;;  %s2526_s4 = inlined_call_operand.vmem [shape: f32[1,784], index: 4, kind: input, shape index: {}]   ;;  %s2527_s5 = inlined_call_operand.hbm [shape: bf16[16,784], index: 5, kind: output, shape index: {}]  }
   0x1   :  { %12 = vsyncpa [#allocation3 + $0x1], 0  ;;  %s1977_s18 = smov 0   ;;  %s1979_s19 = smov 0  }
   0x2   :  { %s1981_s20 = smov 0   ;;  %s1983_s21 = smov 0  }
   0x3 LB: > { %s1998_s22 = sadd.s32 4294967295, %s1943_s21   ;;  %s1452_s23 = sadd.s32 4294967294, %s1943_s21   ;;  %s1943_s21 = sphi %s1983_s21, %s2533_s21   ;;  %s1939_s20 = sphi %s1981_s20, %s2532_s20   ;;  %s1935_s19 = sphi %s1979_s19, %s2531_s19   ;;  %s1931_s18 = sphi %s1977_s18, %s2530_s18  }
   0x4   : > { %s2002_s24 = sadd.s32 1, %s1943_s21   ;;  %s135_s25 = sadd.s32 1, %s1939_s20 }
   0x5   : > { %s132_s26 = ssub.s32 %s1943_s21, %s2002_s24  ;;  %p145_p0 = scmp.ne.s32.totalorder %s1939_s20, %s1935_s19 }
   0x6   : > { %p133_p1 = scmp.eq.s32.totalorder %s132_s26, 0  ;;  %p146_p2 = scmp.eq.s32.totalorder %s1998_s22, 1 }
   0x7   : > { %p151_p3 = scmp.ne.s32.totalorder %s1935_s19, %s1931_s18  ;;  %p152_p4 = scmp.eq.s32.totalorder %s1452_s23, 1 }
   0x8   : > { %s2013_s27 = scalar_select %p133_p1, %s1939_s20, %s135_s25  }
   0x9   : > { %p2015_p5 = por %p146_p2, %p145_p0  ;;  %p2019_p6 = por %p152_p4, %p151_p3 }
   0xa   : > { %p1455_p7 = scmp.ge.s32.totalorder %s1943_s21, 1  ;;  %p189_p8 = scmp.lt.s32.totalorder %s1943_s21, 3 }
   0xc   : > { %p190_p9 = pnand %p1455_p7, %p189_p8 }
   0xd   : > { %v1667_v0 = vld [vmem:[%s2523_s1 + $0x4] ss:$8 sps:$4 sm:$0xff] (!%p190_p9)   ;;  %v1669_v1 = vld [vmem:[%s2523_s1] ss:$8 sps:$4 sm:$0xff] (!%p190_p9)   ;;  %v1945_v2 = vmov (!%p190_p9), 0   ;;  %p216_p10 = scmp.lt.s32.totalorder (!%p190_p9), %s1998_s22, 1  ;;  %v240_v57 = vlaneseq (!%p190_p9) }
   0xe   : > { %193 = sbr.rel (%p190_p9) target bundleno = 757 (0x2f5), region = 40  ;;  %362 = vmatprep.mubr.bf16.mxu0 (!%p190_p9), %v1945_v2  ;;  %330 = vmatprep.subr.bf16.mxu0 (!%p190_p9), %v1667_v0  ;;  %v1670_v3 = vld [vmem:[%s2523_s1 + $0x14] ss:$8 sps:$4 sm:$0xff] (!%p190_p9)   ;;  %v1672_v4 = vld [vmem:[%s2523_s1 + $0x10] ss:$8 sps:$4 sm:$0xff] (!%p190_p9)   ;;  %s213_s14 = sand.u32 (!%p190_p9), 1, %s1935_s19  }
   0xf   : > { %331 = vmatpush1.bf16.msra.mxu0 (!%p190_p9), %v1669_v1  ;;  %v1673_v5 = vld [vmem:[%s2523_s1 + $0x24] ss:$8 sps:$4 sm:$0xff] (!%p190_p9)   ;;  %v1675_v6 = vld [vmem:[%s2523_s1 + $0x20] ss:$8 sps:$4 sm:$0xff] (!%p190_p9)   ;;  %v1676_v7 = vld [vmem:[%s2523_s1 + $0x34] ss:$8 sps:$4 sm:$0xff] (!%p190_p9)  }
  0x10   : > { %332 = vmatprep.subr.bf16.mxu0 (!%p190_p9), %v1670_v3  ;;  %v1678_v8 = vld [vmem:[%s2523_s1 + $0x30] ss:$8 sps:$4 sm:$0xff] (!%p190_p9)   ;;  %v1679_v9 = vld [vmem:[%s2523_s1 + $0x44] ss:$8 sps:$4 sm:$0xff] (!%p190_p9)   ;;  %v1681_v10 = vld [vmem:[%s2523_s1 + $0x40] ss:$8 sps:$4 sm:$0xff] (!%p190_p9)  }
  0x11   : > { %v1682_v11 = vld [vmem:[%s2523_s1 + $0x54] ss:$8 sps:$4 sm:$0xff] (!%p190_p9)   ;;  %v1684_v12 = vld [vmem:[%s2523_s1 + $0x50] ss:$8 sps:$4 sm:$0xff] (!%p190_p9)   ;;  %v1685_v13 = vld [vmem:[%s2523_s1 + $0x64] ss:$8 sps:$4 sm:$0xff] (!%p190_p9)  }
  0x12   : > { %v1687_v14 = vld [vmem:[%s2523_s1 + $0x60] ss:$8 sps:$4 sm:$0xff] (!%p190_p9)   ;;  %v1688_v15 = vld [vmem:[%s2523_s1 + $0x74] ss:$8 sps:$4 sm:$0xff] (!%p190_p9)   ;;  %v1690_v16 = vld [vmem:[%s2523_s1 + $0x70] ss:$8 sps:$4 sm:$0xff] (!%p190_p9)  }
  0x13   : > { %333 = vmatpush1.bf16.msra.mxu0 (!%p190_p9), %v1672_v4  ;;  %v1691_v18 = vld [vmem:[%s2525_s3 + $0x4] ss:$28 sps:$4 sm:$0xff] (!%p190_p9)   ;;  %v1695_v20 = vld [vmem:[%s2525_s3 + $0xc] ss:$28 sps:$4 sm:$0xff] (!%p190_p9)   ;;  %v1697_v22 = vld [vmem:[%s2525_s3 + $0x3c] ss:$28 sps:$4 sm:$0xff] (!%p190_p9)  }
  0x14   : > { %334 = vmatprep.subr.bf16.mxu0 (!%p190_p9), %v1673_v5  ;;  %v1693_v19 = vld [vmem:[%s2525_s3 + $0x8] ss:$28 sps:$4 sm:$0xff] (!%p190_p9)   ;;  %v1696_v21 = vld [vmem:[%s2525_s3] ss:$28 sps:$4 sm:$0xff] (!%p190_p9)   ;;  %1139 = vmatprep.subr.bf16.mxu1 (!%p190_p9), %v1691_v18  ;;  %v1702_v25 = vld [vmem:[%s2525_s3 + $0x38] ss:$28 sps:$4 sm:$0xff] (!%p190_p9)  }
  0x15   : > { %s217_s15 = scalar_select %p216_p10, %s1998_s22, 1  ;;  %v1701_v23 = vld [vmem:[%s2525_s3 + $0x44] ss:$28 sps:$4 sm:$0xff]   ;;  %1140 = vmatpush1.bf16.msra.mxu1 %v1696_v21  ;;  %v1703_v26 = vld [vmem:[%s2525_s3 + $0x74] ss:$28 sps:$4 sm:$0xff]   ;;  %v2195_v58 = vshrl.u32 %v240_v57, 7 }
  0x16   : > { %v1699_v24 = vld [vmem:[%s2525_s3 + $0x40] ss:$28 sps:$4 sm:$0xff]   ;;  %1141 = vmatprep.subr.bf16.mxu1 %v1697_v22  ;;  %v1705_v28 = vld [vmem:[%s2525_s3 + $0x78] ss:$28 sps:$4 sm:$0xff]   ;;  %v1708_v29 = vld [vmem:[%s2525_s3 + $0x70] ss:$28 sps:$4 sm:$0xff]  }
  0x17   : > { %335 = vmatpush1.bf16.msra.mxu0 %v1675_v6  ;;  %s1456_s26 = sshll.u32 %s217_s15, 2  ;;  %v1707_v27 = vld [vmem:[%s2525_s3 + $0x7c] ss:$28 sps:$4 sm:$0xff]   ;;  %v1709_v30 = vld [vmem:[%s2525_s3 + $0xac] ss:$28 sps:$4 sm:$0xff]   ;;  %v242_v59 = vsub.s32 0, %v2195_v58 }
  0x18   : > { %336 = vmatprep.subr.bf16.mxu0 %v1676_v7  ;;  %s219_s9 = scalar_lea.vmem %s2522_s0, %s1456_s26  ;;  %v1713_v31 = vld [vmem:[%s2525_s3 + $0xb4] ss:$28 sps:$4 sm:$0xff]   ;;  %v1714_v33 = vld [vmem:[%s2525_s3 + $0xa8] ss:$28 sps:$4 sm:$0xff]   ;;  %v1720_v37 = vld [vmem:[%s2525_s3 + $0xe0] ss:$28 sps:$4 sm:$0xff]  }
  0x19   : > { %v221_v17 = vld [vmem:[%s219_s9] sm:$0xf]  ;;  %1142 = vmatpush1.bf16.msra.mxu1 %v1702_v25  ;;  %v1711_v32 = vld [vmem:[%s2525_s3 + $0xb0] ss:$28 sps:$4 sm:$0xff]   ;;  %v1717_v36 = vld [vmem:[%s2525_s3 + $0xe8] ss:$28 sps:$4 sm:$0xff]  }
  0x1a   : > { %1143 = vmatprep.subr.bf16.mxu1 %v1703_v26  ;;  %v1715_v34 = vld [vmem:[%s2525_s3 + $0xe4] ss:$28 sps:$4 sm:$0xff]   ;;  %v1719_v35 = vld [vmem:[%s2525_s3 + $0xec] ss:$28 sps:$4 sm:$0xff]   ;;  %v1721_v38 = vld [vmem:[%s2525_s3 + $0x11c] ss:$28 sps:$4 sm:$0xff]  }
  0x1b   : > { %337 = vmatpush1.bf16.msra.mxu0 %v1678_v8  ;;  %v1725_v39 = vld [vmem:[%s2525_s3 + $0x124] ss:$28 sps:$4 sm:$0xff]   ;;  %v1726_v41 = vld [vmem:[%s2525_s3 + $0x118] ss:$28 sps:$4 sm:$0xff]   ;;  %v1732_v45 = vld [vmem:[%s2525_s3 + $0x150] ss:$28 sps:$4 sm:$0xff]  }
  0x1c   : > { %338 = vmatprep.subr.bf16.mxu0 %v1679_v9  ;;  %v1723_v40 = vld [vmem:[%s2525_s3 + $0x120] ss:$28 sps:$4 sm:$0xff]   ;;  %v1727_v42 = vld [vmem:[%s2525_s3 + $0x154] ss:$28 sps:$4 sm:$0xff]   ;;  %v1733_v46 = vld [vmem:[%s2525_s3 + $0x18c] ss:$28 sps:$4 sm:$0xff]  }
  0x1d   : > { %1144 = vmatpush1.bf16.msra.mxu1 %v1708_v29  ;;  %v1731_v43 = vld [vmem:[%s2525_s3 + $0x15c] ss:$28 sps:$4 sm:$0xff]   ;;  %v1737_v47 = vld [vmem:[%s2525_s3 + $0x194] ss:$28 sps:$4 sm:$0xff]   ;;  %v1738_v49 = vld [vmem:[%s2525_s3 + $0x188] ss:$28 sps:$4 sm:$0xff]  }
  0x1e   : > { %1145 = vmatprep.subr.bf16.mxu1 %v1709_v30  ;;  %v1729_v44 = vld [vmem:[%s2525_s3 + $0x158] ss:$28 sps:$4 sm:$0xff]   ;;  %v1735_v48 = vld [vmem:[%s2525_s3 + $0x190] ss:$28 sps:$4 sm:$0xff]   ;;  %v1739_v50 = vld [vmem:[%s2525_s3 + $0x1c4] ss:$28 sps:$4 sm:$0xff]  }
  0x1f   : > { %339 = vmatpush1.bf16.msra.mxu0 %v1681_v10  ;;  %v1743_v51 = vld [vmem:[%s2525_s3 + $0x1cc] ss:$28 sps:$4 sm:$0xff]   ;;  %v1744_v53 = vld [vmem:[%s2525_s3 + $0x1c0] ss:$28 sps:$4 sm:$0xff]   ;;  %v246_v61 = vsub.s32 1, %v2195_v58  ;;  %s1625_s15 = smul.u32 28, %s213_s14 }
  0x20   : > { %340 = vmatprep.subr.bf16.mxu0 %v1682_v11  ;;  %v1741_v52 = vld [vmem:[%s2525_s3 + $0x1c8] ss:$28 sps:$4 sm:$0xff]   ;;  %v1745_v54 = vld [vmem:[%s2525_s3 + $0x1fc] ss:$28 sps:$4 sm:$0xff]   ;;  %v238_v60 = vld [vmem:[%s2524_s2] sm:$0x3] }
  0x21   : > { %1146 = vmatpush1.bf16.msra.mxu1 %v1714_v33  ;;  %v1749_v55 = vld [vmem:[%s2525_s3 + $0x204] ss:$28 sps:$4 sm:$0xff]   ;;  %v243_v62 = vrot.slane %v238_v60, %v242_v59  ;;  %v247_v63 = vrot.slane %v238_v60, %v246_v61  ;;  %v1756_v18 = vld [vmem:[%s2525_s3 + $0x230] ss:$28 sps:$4 sm:$0xff]   ;;  %v1774_v30 = vld [vmem:[%s2525_s3 + $0x2d8] ss:$28 sps:$4 sm:$0xff]  }
  0x22   : > { %1147 = vmatprep.subr.bf16.mxu1 %v1715_v34  ;;  %v1747_v56 = vld [vmem:[%s2525_s3 + $0x200] ss:$28 sps:$4 sm:$0xff]   ;;  %v1759_v21 = vld [vmem:[%s2525_s3 + $0x270] ss:$28 sps:$4 sm:$0xff]   ;;  %v1762_v22 = vld [vmem:[%s2525_s3 + $0x268] ss:$28 sps:$4 sm:$0xff]  }
  0x23   : > { %341 = vmatpush1.bf16.msra.mxu0 %v1684_v12  ;;  %v1765_v25 = vld [vmem:[%s2525_s3 + $0x2a8] ss:$28 sps:$4 sm:$0xff]   ;;  %v1768_v26 = vld [vmem:[%s2525_s3 + $0x2a0] ss:$28 sps:$4 sm:$0xff]   ;;  %v1777_v33 = vld [vmem:[%s2525_s3 + $0x318] ss:$28 sps:$4 sm:$0xff]  }
  0x24   : > { %342 = vmatprep.subr.bf16.mxu0 %v1685_v13  ;;  %v1773_v29 = vld [vmem:[%s2525_s3 + $0x2e4] ss:$28 sps:$4 sm:$0xff]   ;;  %v1780_v34 = vld [vmem:[%s2525_s3 + $0x310] ss:$28 sps:$4 sm:$0xff]   ;;  %v1791_v57 = vld [vmem:[%s2525_s3 + $0x18] ss:$28 sps:$4 sm:$0xff]  }
  0x25   : > { %1148 = vmatpush1.bf16.msra.mxu1 %v1720_v37  ;;  %v1783_v37 = vld [vmem:[%s2525_s3 + $0x350] ss:$28 sps:$4 sm:$0xff]   ;;  %s2463_s16 = scalar_lea.vmem [#allocation2], %s1625_s15  ;;  %vm1376_vm2 = vcmask 125952   ;;  %s1626_s17 = smul.u32 448, %s1998_s22 }
  0x26   : > { %1149 = vmatprep.subr.bf16.mxu1 %v1721_v38  ;;  %v1786_v38 = vld [vmem:[%s2525_s3 + $0x348] ss:$28 sps:$4 sm:$0xff]   ;;  %s1393_s23 = sshll.u32 %s2463_s16, 4  ;;  %s1379_s6 = scalar_lea.sflag [#allocation3], %s213_s14  ;;  %s2479_s23 = int_to_ptr.vmem [resolvable:$true] %s1393_s23 }
  0x27   : > { %343 = vmatpush1.bf16.msra.mxu0 %v1687_v14  ;;  %v1750_v14 = vld [vmem:[%s2525_s3 + $0x1f8] ss:$28 sps:$4 sm:$0xff]   ;;  %v1794_v60 = vld [vmem:[%s2525_s3 + $0x4c] ss:$28 sps:$4 sm:$0xff]   ;;  %s2477_s30 = scalar_lea.hbm %s2527_s5, %s1626_s17  ;;  %s1881_s7 = scalar_lea.vmem %s2479_s23, 448 }
  0x28   : > { %344 = vmatprep.subr.bf16.mxu0 %v1688_v15  ;;  %v1751_v15 = vld [vmem:[%s2525_s3 + $0x234] ss:$28 sps:$4 sm:$0xff]   ;;  %p1882_p11 = scmp.ne.s32.totalorder %s2479_s23, %s1881_s7  ;;  %s1946_s22 = smov [#allocation2]  }
  0x29   : > { %1150 = vmatpush1.bf16.msra.mxu1 %v1726_v41  ;;  %s1885_s8 = sshll.u32 %s1946_s22, 4  ;;  %s1886_s8 = int_to_ptr.vmem [resolvable:$false] %s1885_s8 }
  0x2a   : > { %1151 = vmatprep.subr.bf16.mxu1 %v1727_v42  ;;  %p1883_p12 = pnand %p1882_p11, %p2015_p5  ;;  %s1887_s9 = scalar_lea.vmem %s1886_s8, 896 }
  0x2b   : > { %345 = vmatpush1.bf16.msra.mxu0 %v1690_v16  ;;  %v1755_v16 = vld [vmem:[%s2525_s3 + $0x23c] ss:$28 sps:$4 sm:$0xff]   ;;  %p1888_p0 = scmp.lt.s32.totalorder %s2479_s23, %s1886_s8  ;;  %p1889_p1 = scmp.lt.s32.totalorder %s1887_s9, %s1881_s7 }
  0x2c   : > { %1180 = vmatprep.subr.bf16.mxu0 %v1695_v20  ;;  %v1761_v20 = vld [vmem:[%s2525_s3 + $0x274] ss:$28 sps:$4 sm:$0xff]   ;;  %p1884_p13 = pneg %p1883_p12 }
  0x2d   : > { %1152 = vmatpush1.bf16.msra.mxu1 %v1732_v45  ;;  %p1890_p2 = por %p1889_p1, %p1888_p0 }
  0x2e   : > { %363 = vmatmul.mubr.bf16.vlgmr.msra.gmra.mrb[0].mxu0 %v221_v17  ;;  %1153 = vmatprep.subr.bf16.mxu1 %v1733_v46  ;;  %v1753_v17 = vld [vmem:[%s2525_s3 + $0x238] ss:$28 sps:$4 sm:$0xff]  }
  0x2f   : > { %1181 = vmatpush1.bf16.msra.mxu0 %v1693_v19  ;;  %v1757_v19 = vld [vmem:[%s2525_s3 + $0x26c] ss:$28 sps:$4 sm:$0xff]   ;;  %p1891_p3 = pnand %p1890_p2, %p1884_p13 }
  0x30   : > { %1182 = vmatprep.subr.bf16.mxu0 %v1701_v23  ;;  %v1763_v23 = vld [vmem:[%s2525_s3 + $0x2a4] ss:$28 sps:$4 sm:$0xff]  }
  0x31   : > { %1154 = vmatpush1.bf16.msra.mxu1 %v1738_v49 }
  0x32   : > { %1155 = vmatprep.subr.bf16.mxu1 %v1739_v50 }
  0x33   : > { %1183 = vmatpush1.bf16.msra.mxu0 %v1699_v24  ;;  %v1767_v24 = vld [vmem:[%s2525_s3 + $0x2ac] ss:$28 sps:$4 sm:$0xff]  }
  0x34   : > { %1184 = vmatprep.subr.bf16.mxu0 %v1707_v27  ;;  %v1769_v27 = vld [vmem:[%s2525_s3 + $0x2dc] ss:$28 sps:$4 sm:$0xff]  }
  0x35   : > { %1156 = vmatpush1.bf16.msra.mxu1 %v1744_v53 }
  0x36   : > { %1157 = vmatprep.subr.bf16.mxu1 %v1745_v54 }
  0x37   : > { %1185 = vmatpush1.bf16.msra.mxu0 %v1705_v28  ;;  %v1771_v28 = vld [vmem:[%s2525_s3 + $0x2e0] ss:$28 sps:$4 sm:$0xff]  }
  0x38   : > { %1186 = vmatprep.subr.bf16.mxu0 %v1713_v31  ;;  %v1775_v31 = vld [vmem:[%s2525_s3 + $0x314] ss:$28 sps:$4 sm:$0xff]  }
  0x39   : > { %1158 = vmatpush1.bf16.msra.mxu1 %v1750_v14  ;;  %v1815_v14 = vld [vmem:[%s2525_s3 + $0x2f0] ss:$28 sps:$4 sm:$0xff]  }
  0x3a   : > { %1159 = vmatprep.subr.bf16.mxu1 %v1751_v15  ;;  %v1812_v15 = vld [vmem:[%s2525_s3 + $0x128] ss:$28 sps:$4 sm:$0xff]  }
  0x3b   : > { %1187 = vmatpush1.bf16.msra.mxu0 %v1711_v32  ;;  %v1779_v32 = vld [vmem:[%s2525_s3 + $0x31c] ss:$28 sps:$4 sm:$0xff]  }
  0x3c   : > { %1188 = vmatprep.subr.bf16.mxu0 %v1719_v35  ;;  %v1781_v35 = vld [vmem:[%s2525_s3 + $0x34c] ss:$28 sps:$4 sm:$0xff]  }
  0x3d   : > { %1160 = vmatpush1.bf16.msra.mxu1 %v1756_v18  ;;  %v1820_v18 = vld [vmem:[%s2525_s3 + $0x328] ss:$28 sps:$4 sm:$0xff]  }
  0x3e   : > { %1161 = vmatprep.subr.bf16.mxu1 %v1757_v19  ;;  %v1817_v19 = vld [vmem:[%s2525_s3 + $0x160] ss:$28 sps:$4 sm:$0xff]  }
  0x3f   : > { %1189 = vmatpush1.bf16.msra.mxu0 %v1717_v36  ;;  %v1785_v36 = vld [vmem:[%s2525_s3 + $0x354] ss:$28 sps:$4 sm:$0xff]  }
  0x40   : > { %1190 = vmatprep.subr.bf16.mxu0 %v1725_v39  ;;  %v1789_v39 = vld [vmem:[%s2525_s3 + $0x14] ss:$28 sps:$4 sm:$0xff]  }
  0x41   : > { %1162 = vmatpush1.bf16.msra.mxu1 %v1762_v22  ;;  %v1825_v22 = vld [vmem:[%s2525_s3 + $0x360] ss:$28 sps:$4 sm:$0xff]  }
  0x42   : > { %1163 = vmatprep.subr.bf16.mxu1 %v1763_v23  ;;  %v1822_v23 = vld [vmem:[%s2525_s3 + $0x198] ss:$28 sps:$4 sm:$0xff]  }
  0x43   : > { %1191 = vmatpush1.bf16.msra.mxu0 %v1723_v40  ;;  %v1790_v40 = vld [vmem:[%s2525_s3 + $0x1d8] ss:$28 sps:$4 sm:$0xff]  }
  0x44   : > { %1192 = vmatprep.subr.bf16.mxu0 %v1731_v43 }
  0x45   : > { %1164 = vmatpush1.bf16.msra.mxu1 %v1768_v26  ;;  %v1827_v26 = vld [vmem:[%s2525_s3 + $0x1d0] ss:$28 sps:$4 sm:$0xff]  }
  0x46   : > { %1165 = vmatprep.subr.bf16.mxu1 %v1769_v27  ;;  %v1832_v27 = vld [vmem:[%s2525_s3 + $0x20c] ss:$28 sps:$4 sm:$0xff]  }
  0x47   : > { %1193 = vmatpush1.bf16.msra.mxu0 %v1729_v44 }
  0x48   : > { %1194 = vmatprep.subr.bf16.mxu0 %v1737_v47 }
  0x49   : > { %1166 = vmatpush1.bf16.msra.mxu1 %v1774_v30  ;;  %v1833_v30 = vld [vmem:[%s2525_s3 + $0x240] ss:$28 sps:$4 sm:$0xff]  }
  0x4a   : > { %1167 = vmatprep.subr.bf16.mxu1 %v1775_v31  ;;  %v1838_v31 = vld [vmem:[%s2525_s3 + $0x27c] ss:$28 sps:$4 sm:$0xff]  }
  0x4b   : > { %1195 = vmatpush1.bf16.msra.mxu0 %v1735_v48 }
  0x4c   : > { %1196 = vmatprep.subr.bf16.mxu0 %v1743_v51 }
  0x4d   : > { %1168 = vmatpush1.bf16.msra.mxu1 %v1780_v34  ;;  %v1839_v34 = vld [vmem:[%s2525_s3 + $0x2b0] ss:$28 sps:$4 sm:$0xff]  }
  0x4e   : > { %1169 = vmatprep.subr.bf16.mxu1 %v1781_v35  ;;  %v1844_v35 = vld [vmem:[%s2525_s3 + $0x2ec] ss:$28 sps:$4 sm:$0xff]  }
  0x4f   : > { %1197 = vmatpush1.bf16.msra.mxu0 %v1741_v52 }
  0x50   : > { %1198 = vmatprep.subr.bf16.mxu0 %v1749_v55  ;;  %v1787_v55 = vld [vmem:[%s2525_s3 + $0x10] ss:$28 sps:$4 sm:$0xff]  }
  0x51   : > { %1170 = vmatpush1.bf16.msra.mxu1 %v1786_v38  ;;  %v1845_v38 = vld [vmem:[%s2525_s3 + $0x320] ss:$28 sps:$4 sm:$0xff]  }
  0x52   : > { %1221 = vmatprep.subr.bf16.mxu1 %v1789_v39  ;;  %v1850_v39 = vld [vmem:[%s2525_s3 + $0x35c] ss:$28 sps:$4 sm:$0xff]  }
  0x53   : > { %1199 = vmatpush1.bf16.msra.mxu0 %v1747_v56 }
  0x54   : > { %1200 = vmatprep.subr.bf16.mxu0 %v1755_v16  ;;  %v1816_v16 = vld [vmem:[%s2525_s3 + $0x130] ss:$28 sps:$4 sm:$0xff]  }
  0x57   : > { %1201 = vmatpush1.bf16.msra.mxu0 %v1753_v17  ;;  %v1819_v17 = vld [vmem:[%s2525_s3 + $0x164] ss:$28 sps:$4 sm:$0xff]  }
  0x58   : > { %1202 = vmatprep.subr.bf16.mxu0 %v1761_v20  ;;  %v1821_v20 = vld [vmem:[%s2525_s3 + $0x168] ss:$28 sps:$4 sm:$0xff]  }
  0x5b   : > { %1203 = vmatpush1.bf16.msra.mxu0 %v1759_v21  ;;  %v1824_v21 = vld [vmem:[%s2525_s3 + $0x19c] ss:$28 sps:$4 sm:$0xff]  }
  0x5c   : > { %1204 = vmatprep.subr.bf16.mxu0 %v1767_v24  ;;  %v1826_v24 = vld [vmem:[%s2525_s3 + $0x1a0] ss:$28 sps:$4 sm:$0xff]  }
  0x5f   : > { %1205 = vmatpush1.bf16.msra.mxu0 %v1765_v25  ;;  %v1829_v25 = vld [vmem:[%s2525_s3 + $0x1d4] ss:$28 sps:$4 sm:$0xff]  }
  0x60   : > { %1206 = vmatprep.subr.bf16.mxu0 %v1773_v29  ;;  %v1835_v29 = vld [vmem:[%s2525_s3 + $0x244] ss:$28 sps:$4 sm:$0xff]  }
  0x63   : > { %1207 = vmatpush1.bf16.msra.mxu0 %v1771_v28  ;;  %v1830_v28 = vld [vmem:[%s2525_s3 + $0x208] ss:$28 sps:$4 sm:$0xff]  }
  0x64   : > { %1208 = vmatprep.subr.bf16.mxu0 %v1779_v32  ;;  %v1836_v32 = vld [vmem:[%s2525_s3 + $0x278] ss:$28 sps:$4 sm:$0xff]  }
  0x67   : > { %1209 = vmatpush1.bf16.msra.mxu0 %v1777_v33  ;;  %v1841_v33 = vld [vmem:[%s2525_s3 + $0x2b4] ss:$28 sps:$4 sm:$0xff]  }
  0x68   : > { %1210 = vmatprep.subr.bf16.mxu0 %v1785_v36  ;;  %v1842_v36 = vld [vmem:[%s2525_s3 + $0x2e8] ss:$28 sps:$4 sm:$0xff]  }
  0x6b   : > { %1211 = vmatpush1.bf16.msra.mxu0 %v1783_v37  ;;  %v1847_v37 = vld [vmem:[%s2525_s3 + $0x324] ss:$28 sps:$4 sm:$0xff]  }
  0x6c   : > { %1603 = vmatprep.subr.bf16.mxu0 %v1790_v40  ;;  %v1848_v40 = vld [vmem:[%s2525_s3 + $0x358] ss:$28 sps:$4 sm:$0xff]  }
 0x101   : > { %v364_v0 = vpop.f32.mrb[0].mxu0 }
 0x102   : > { %v365_v1 = vadd.f32 %v364_v0, %v243_v62  ;;  %v366_v2 = vpop.f32.mrb[1].mxu0  ;;  %v1795_v62 = vld [vmem:[%s2525_s3 + $0x210] ss:$28 sps:$4 sm:$0xff]  }
 0x103   : > { %v367_v3 = vadd.f32 %v366_v2, %v247_v63  ;;  %v368_v4 = vpop.f32.mrb[2].mxu0  ;;  %v1792_v63 = vld [vmem:[%s2525_s3 + $0x48] ss:$28 sps:$4 sm:$0xff]   ;;  %v1796_v0 = vld [vmem:[%s2525_s3 + $0x50] ss:$28 sps:$4 sm:$0xff]  }
 0x104   : > { %v373_v5 = vmul.f32 0.02, %v365_v1  ;;  %v369_v6 = vpop.f32.mrb[3].mxu0  ;;  %vm371_vm0 = vcmp.gt.f32.partialorder %v365_v1, 0.0  ;;  %v1800_v2 = vld [vmem:[%s2525_s3 + $0x248] ss:$28 sps:$4 sm:$0xff]  }
 0x105   : > { %v374_v7 = vmul.f32 0.02, %v367_v3  ;;  %vm372_vm1 = vcmp.gt.f32.partialorder %v367_v3, 0.0  ;;  %v1801_v4 = vld [vmem:[%s2525_s3 + $0x88] ss:$28 sps:$4 sm:$0xff]  }
 0x106   : > { %v2206_v8 = vsel %vm371_vm0, %v365_v1, %v373_v5  ;;  %v1799_v1 = vld [vmem:[%s2525_s3 + $0x84] ss:$28 sps:$4 sm:$0xff]   ;;  %v1804_v5 = vld [vmem:[%s2525_s3 + $0xbc] ss:$28 sps:$4 sm:$0xff]  }
 0x107   : > { %v2208_v9 = vsel %vm372_vm1, %v367_v3, %v374_v7  ;;  %v380_v11 = vmul.f32 %v2206_v8, %v2206_v8  ;;  %v1797_v3 = vld [vmem:[%s2525_s3 + $0x80] ss:$28 sps:$4 sm:$0xff]   ;;  %v1802_v7 = vld [vmem:[%s2525_s3 + $0xb8] ss:$28 sps:$4 sm:$0xff]  }
 0x108   : > { %v377_v10 = vadd.f32 %v2208_v9, %v2206_v8  ;;  %v381_v12 = vmul.f32 %v2208_v9, %v2208_v9  ;;  %v1805_v6 = vld [vmem:[%s2525_s3 + $0x280] ss:$28 sps:$4 sm:$0xff]  }
 0x10a   : > { %378 = vadd.xlane.f32.xlu0 %v377_v10  ;;  %v382_v13 = vadd.f32 %v381_v12, %v380_v11  ;;  %v1810_v10 = vld [vmem:[%s2525_s3 + $0x2b8] ss:$28 sps:$4 sm:$0xff]   ;;  %v1807_v11 = vld [vmem:[%s2525_s3 + $0xf0] ss:$28 sps:$4 sm:$0xff]  }
 0x10b   : > { %v1811_v12 = vld [vmem:[%s2525_s3 + $0xf8] ss:$28 sps:$4 sm:$0xff]  }
 0x10e   : > { %383 = vadd.xlane.f32.xlu0 %v382_v13  ;;  %v1814_v13 = vld [vmem:[%s2525_s3 + $0x12c] ss:$28 sps:$4 sm:$0xff]  }
 0x197   : > { %v379_v41 = vpop.xlane.xlu0 %378 }
 0x198   : > { %v385_v42 = vmul.f32 0.005, %v379_v41  ;;  %v538_v41 = vsub.s32 2, %v2195_v58 }
 0x19a   : > { %v387_v44 = vmul.f32 %v385_v42, %v385_v42  ;;  %v390_v49 = vsub.f32 %v2206_v8, %v385_v42  ;;  %v391_v50 = vsub.f32 %v2208_v9, %v385_v42  ;;  %v1806_v8 = vld [vmem:[%s2525_s3 + $0xc0] ss:$28 sps:$4 sm:$0xff]   ;;  %v1809_v9 = vld [vmem:[%s2525_s3 + $0xf4] ss:$28 sps:$4 sm:$0xff]  }
 0x19b   : > { %v384_v43 = vpop.xlane.xlu0 %383  ;;  %v2447_v42 = vld [vmem:[%s2526_s4] sm:$0x7f] }
 0x19c   : > { %v386_v45 = vmul.f32 0.005, %v384_v43  ;;  %v542_v43 = vsub.s32 3, %v2195_v58 }
 0x19e   : > { %v388_v46 = vsub.f32 %v386_v45, %v387_v44  ;;  %v531_v44 = vrot.slane %v2447_v42, %v242_v59  ;;  %v539_v45 = vrot.slane %v2447_v42, %v538_v41 }
 0x1a0   : > { %v389_v47 = vmax.f32 %v388_v46, 0.0  ;;  %v535_v46 = vrot.slane %v2447_v42, %v246_v61 }
 0x1a2   : > { %v392_v48 = vadd.f32 1e-05, %v389_v47  ;;  %v543_v47 = vrot.slane %v2447_v42, %v542_v43 }
 0x1a4   : > { %1851 = vrsqrt.f32 %v392_v48 }
 0x1ae   : > { %v1852_v51 = vpop.eup %1851 }
 0x1af   : > { %v395_v52 = vmul.f32 %v1852_v51, %v391_v50  ;;  %v394_v53 = vmul.f32 %v1852_v51, %v390_v49 }
 0x1b1   : > { %v397_v54 = vpack.c.bf16 %v395_v52, %v395_v52  ;;  %v2302_v56 = vpack.c.bf16 %v394_v53, %v394_v53 }
 0x1b3   : > { %1171 = vmatprep.mubr.bf16.mxu1 %v397_v54  ;;  %1212 = vmatprep.mubr.bf16.mxu0 %v397_v54 }
 0x1b4   : > { %1172 = vmatmul.mubr.bf16.vlgmr.msra.gmra.mrb[0].mxu1 %v2302_v56  ;;  %1213 = vmatmul.mubr.bf16.vlgmr.msra.gmra.mrb[4].mxu0 %v2302_v56 }
 0x1b5   : > { %1222 = vmatpush1.bf16.msra.mxu1 %v1787_v55  ;;  %1604 = vmatpush3.bf16.msra.mxu0 %v1791_v57 }
 0x1b6   : > { %1253 = vmatprep.mubr.bf16.mxu1 %v397_v54  ;;  %1294 = vmatprep.mubr.bf16.mxu0 %v397_v54 }
 0x1b7   : > { %1223 = vmatprep.subr.bf16.mxu1 %v1794_v60  ;;  %1605 = vmatprep.subr.bf16.mxu0 %v1795_v62 }
 0x1b9   : > { %1224 = vmatpush1.bf16.msra.mxu1 %v1792_v63  ;;  %1606 = vmatpush3.bf16.msra.mxu0 %v1796_v0 }
 0x1ba   : > { %1225 = vmatprep.subr.bf16.mxu1 %v1799_v1  ;;  %1607 = vmatprep.subr.bf16.mxu0 %v1800_v2 }
 0x1bd   : > { %1226 = vmatpush1.bf16.msra.mxu1 %v1797_v3  ;;  %1608 = vmatpush3.bf16.msra.mxu0 %v1801_v4 }
 0x1be   : > { %1227 = vmatprep.subr.bf16.mxu1 %v1804_v5  ;;  %1609 = vmatprep.subr.bf16.mxu0 %v1805_v6 }
 0x1c1   : > { %1228 = vmatpush1.bf16.msra.mxu1 %v1802_v7  ;;  %1610 = vmatpush3.bf16.msra.mxu0 %v1806_v8 }
 0x1c2   : > { %1229 = vmatprep.subr.bf16.mxu1 %v1809_v9  ;;  %1611 = vmatprep.subr.bf16.mxu0 %v1810_v10  ;;  %v554_v10 = vsub.s32 6, %v2195_v58 }
 0x1c5   : > { %1230 = vmatpush1.bf16.msra.mxu1 %v1807_v11  ;;  %1612 = vmatpush3.bf16.msra.mxu0 %v1811_v12 }
 0x1c6   : > { %1231 = vmatprep.subr.bf16.mxu1 %v1814_v13  ;;  %1613 = vmatprep.subr.bf16.mxu0 %v1815_v14 }
 0x1c9   : > { %1232 = vmatpush1.bf16.msra.mxu1 %v1812_v15  ;;  %1614 = vmatpush3.bf16.msra.mxu0 %v1816_v16  ;;  %v555_v16 = vrot.slane %v2447_v42, %v554_v10 }
 0x1ca   : > { %1233 = vmatprep.subr.bf16.mxu1 %v1819_v17  ;;  %1615 = vmatprep.subr.bf16.mxu0 %v1820_v18 }
 0x1cd   : > { %1234 = vmatpush1.bf16.msra.mxu1 %v1817_v19  ;;  %1616 = vmatpush3.bf16.msra.mxu0 %v1821_v20 }
 0x1ce   : > { %1235 = vmatprep.subr.bf16.mxu1 %v1824_v21  ;;  %1617 = vmatprep.subr.bf16.mxu0 %v1825_v22 }
 0x1d1   : > { %1236 = vmatpush1.bf16.msra.mxu1 %v1822_v23  ;;  %1618 = vmatpush3.bf16.msra.mxu0 %v1826_v24 }
 0x1d2   : > { %1237 = vmatprep.subr.bf16.mxu1 %v1829_v25 }
 0x1d4   : > { %1295 = vmatmul.mubr.bf16.vlgmr.msra.gmra.mrb[8].mxu0 %v2302_v56 }
 0x1d5   : > { %1238 = vmatpush1.bf16.msra.mxu1 %v1827_v26  ;;  %v546_v26 = vsub.s32 4, %v2195_v58 }
 0x1d6   : > { %1239 = vmatprep.subr.bf16.mxu1 %v1832_v27  ;;  %v550_v27 = vsub.s32 5, %v2195_v58 }
 0x1d9   : > { %1240 = vmatpush1.bf16.msra.mxu1 %v1830_v28  ;;  %v547_v28 = vrot.slane %v2447_v42, %v546_v26 }
 0x1da   : > { %1241 = vmatprep.subr.bf16.mxu1 %v1835_v29  ;;  %v551_v29 = vrot.slane %v2447_v42, %v550_v27 }
 0x1dd   : > { %1242 = vmatpush1.bf16.msra.mxu1 %v1833_v30 }
 0x1de   : > { %1243 = vmatprep.subr.bf16.mxu1 %v1838_v31 }
 0x1e1   : > { %1244 = vmatpush1.bf16.msra.mxu1 %v1836_v32 }
 0x1e2   : > { %1245 = vmatprep.subr.bf16.mxu1 %v1841_v33 }
 0x1e5   : > { %1246 = vmatpush1.bf16.msra.mxu1 %v1839_v34 }
 0x1e6   : > { %1247 = vmatprep.subr.bf16.mxu1 %v1844_v35 }
 0x1e9   : > { %1248 = vmatpush1.bf16.msra.mxu1 %v1842_v36 }
 0x1ea   : > { %1249 = vmatprep.subr.bf16.mxu1 %v1847_v37 }
 0x1ed   : > { %1250 = vmatpush1.bf16.msra.mxu1 %v1845_v38 }
 0x1ee   : > { %1251 = vmatprep.subr.bf16.mxu1 %v1850_v39 }
 0x1f1   : > { %1252 = vmatpush1.bf16.msra.mxu1 %v1848_v40 }
 0x1f4   : > { %1254 = vmatmul.mubr.bf16.vlgmr.msra.gmra.mrb[4].mxu1 %v2302_v56 }
 0x287   : > { %v1173_v48 = vpop.f32.mrb[0].mxu1  ;;  %v1214_v49 = vpop.f32.mrb[4].mxu0 }
 0x288   : > { %v1174_v50 = vadd.f32 %v1173_v48, %v531_v44  ;;  %v1215_v51 = vadd.f32 %v1214_v49, %v539_v45  ;;  %v1175_v52 = vpop.f32.mrb[1].mxu1  ;;  %v1216_v53 = vpop.f32.mrb[5].mxu0 }
 0x289   : > { %v1176_v54 = vadd.f32 %v1175_v52, %v535_v46  ;;  %v1217_v55 = vadd.f32 %v1216_v53, %v543_v47  ;;  %v1177_v56 = vpop.f32.mrb[2].mxu1  ;;  %v1218_v57 = vpop.f32.mrb[6].mxu0 }
 0x28a   : > { %v1585_v60 = vmul.f32 -1.442695, %v1174_v50  ;;  %v1587_v59 = vmul.f32 -1.442695, %v1215_v51  ;;  %v1178_v62 = vpop.f32.mrb[3].mxu1  ;;  %v1219_v63 = vpop.f32.mrb[7].mxu0 }
 0x28b   : > { %v1586_v0 = vmul.f32 -1.442695, %v1176_v54  ;;  %v1588_v1 = vmul.f32 -1.442695, %v1217_v55 }
 0x28c   : > { %1853 = vpow2.f32 %v1585_v60 }
 0x28d   : > { %1855 = vpow2.f32 %v1587_v59 }
 0x28e   : > { %1857 = vpow2.f32 %v1586_v0 }
 0x28f   : > { %1859 = vpow2.f32 %v1588_v1 }
 0x296   : > { %v1854_v61 = vpop.eup %1853 }
 0x297   : > { %v1856_v2 = vpop.eup %1855  ;;  %v1323_v3 = vadd.f32 1.0, %v1854_v61 }
 0x298   : > { %v1858_v4 = vpop.eup %1857  ;;  %v1325_v5 = vadd.f32 1.0, %v1856_v2 }
 0x299   : > { %v1860_v6 = vpop.eup %1859  ;;  %1861 = vrcp.f32 %v1323_v3  ;;  %v1324_v7 = vadd.f32 1.0, %v1858_v4 }
 0x29a   : > { %1863 = vrcp.f32 %v1325_v5  ;;  %v1326_v8 = vadd.f32 1.0, %v1860_v6 }
 0x29b   : > { %1865 = vrcp.f32 %v1324_v7 }
 0x29c   : > { %1867 = vrcp.f32 %v1326_v8 }
 0x2a3   : > { %v1862_v9 = vpop.eup %1861 }
 0x2a4   : > { %v1864_v11 = vpop.eup %1863 }
 0x2a5   : > { %v1866_v12 = vpop.eup %1865 }
 0x2a6   : > { %v1868_v13 = vpop.eup %1867  ;;  %v1599_v14 = vpack.c.bf16 %v1866_v12, %v1862_v9 }
 0x2a7   : > { %v1619_v15 = vpop.f32.mrb[8].mxu0  ;;  %v1600_v17 = vpack.c.bf16 %v1868_v13, %v1864_v11 }
 0x2a8   : > { %v1620_v18 = vpop.f32.mrb[9].mxu0  ;;  %1373 = vst [vmem:[%s2463_s16] sm:$0xff] %v1599_v14 }
 0x2a9   : > { %v1621_v19 = vadd.f32 %v1620_v18, %v1619_v15  ;;  %v1622_v20 = vpop.f32.mrb[10].mxu0  ;;  %1374 = vst [vmem:[%s2463_s16 + $0x8] sm:$0xff] %v1600_v17 }
 0x2aa   : > { %v1623_v21 = vpop.f32.mrb[11].mxu0 }
 0x2ab   : > { %v1297_v22 = vadd.f32 %v1621_v19, %v555_v16 }
 0x2ad   : > { %v1591_v23 = vmul.f32 -1.442695, %v1297_v22 }
 0x2af   : > { %1869 = vpow2.f32 %v1591_v23 }
 0x2b9   : > { %v1870_v24 = vpop.eup %1869 }
 0x2ba   : > { %v1329_v25 = vadd.f32 1.0, %v1870_v24 }
 0x2bc   : > { %1871 = vrcp.f32 %v1329_v25 }
 0x2c6   : > { %v1872_v30 = vpop.eup %1871 }
 0x2c7   : > { %v1602_v31 = vpack.c.bf16 %v1872_v30, %v1872_v30  ;;  %v1255_v32 = vpop.f32.mrb[4].mxu1 }
 0x2c8   : > { %v1256_v33 = vadd.f32 %v1255_v32, %v547_v28  ;;  %v1257_v34 = vpop.f32.mrb[5].mxu1 }
 0x2c9   : > { %v1258_v35 = vadd.f32 %v1257_v34, %v551_v29  ;;  %v1259_v36 = vpop.f32.mrb[6].mxu1  ;;  %1377 = vst.msk [vmem:[%s2463_s16 + $0x18] sm:$0xf] %vm1376_vm2, %v1602_v31 }
 0x2ca   : > { %v1589_v37 = vmul.f32 -1.442695, %v1256_v33  ;;  %v1260_v38 = vpop.f32.mrb[7].mxu1 }
 0x2cb   : > { %v1590_v39 = vmul.f32 -1.442695, %v1258_v35 }
 0x2cc   : > { %1873 = vpow2.f32 %v1589_v37 }
 0x2cd   : > { %1875 = vpow2.f32 %v1590_v39 }
 0x2d6   : > { %v1874_v58 = vpop.eup %1873 }
 0x2d7   : > { %v1876_v40 = vpop.eup %1875  ;;  %v1327_v41 = vadd.f32 1.0, %v1874_v58 }
 0x2d8   : > { %v1328_v42 = vadd.f32 1.0, %v1876_v40 }
 0x2d9   : > { %1877 = vrcp.f32 %v1327_v41 }
 0x2da   : > { %1879 = vrcp.f32 %v1328_v42 }
 0x2e3   : > { %v1878_v43 = vpop.eup %1877 }
 0x2e4   : > { %v1880_v44 = vpop.eup %1879 }
 0x2e5   : > { %v1601_v45 = vpack.c.bf16 %v1880_v44, %v1878_v43 }
 0x2e7   : > { %1375 = vst [vmem:[%s2463_s16 + $0x10] sm:$0xff] %v1601_v45 }
 0x2e8   : > { %1894 = shalt.err (!%p1891_p3)
}
 0x2e9   : > { %s1895_s10 = scalar_lea.hbm %s2477_s30, 448  ;;  %s1899_s13 = scalar_lea.hbm %s2527_s5, 896 }
 0x2ea   : > { %p1896_p4 = scmp.ne.s32.totalorder %s2477_s30, %s1895_s10  ;;  %p1900_p9 = scmp.lt.u32.totalorder %s2477_s30, %s2527_s5 }
 0x2eb   : > { %p1901_p10 = scmp.lt.u32.totalorder %s1899_s13, %s1895_s10  ;;  %p1903_p12 = scmp.lt.u32.totalorder %s1895_s10, %s2477_s30 }
 0x2ec   : > { %p1897_p7 = pnand %p1896_p4, %p2015_p5 }
 0x2ed   : > { %p1902_p11 = por %p1901_p10, %p1900_p9 }
 0x2ee   : > { %p1898_p8 = pneg %p1897_p7 }
 0x2ef   : > { %p1904_p13 = por %p1903_p12, %p1902_p11 }
 0x2f1   : > { %p1905_p0 = pnand %p1904_p13, %p1898_p8 }
 0x2f3   : > { %1908 = shalt.err (!%p1905_p0)
}
 0x2f4   : > { %1627 = dma.vmem_to_hbm [thread:$0]  (%p2015_p5), %s2479_s23, 448, %s2477_s30, %s1379_s6  }
 0x2f5 PF: > { %p1633_p1 = scmp.ge.s32.totalorder %s1943_s21, 2  ;;  %s1405_s16 = sand.u32 1, %s1931_s18  }
 0x2f6   : > { %s1406_s17 = scalar_lea.sflag [#allocation3], %s1405_s16 }
 0x2f7   : > { %p1630_p2 = pnand %p1633_p1, %p2019_p6 }
 0x2f9   : > { %1926 = dma.done.wait (!%p1630_p2), %s1406_s17, 448  }
 0x2fa   : > { %1928 = vsyncadd (!%p1630_p2), %s1406_s17, 4294966848  ;;  %p15_p3 = scmp.ge.s32.totalorder %s2002_s24, 4   ;;  %s2530_s18 = smov %s1935_s19 }
 0x2fb   : > { %s2531_s19 = smov %s1939_s20  ;;  %s2532_s20 = smov %s2013_s27 }
 0x2fc   : > { %s2533_s21 = smov %s2002_s24  ;;  %17 = sbr.rel (!%p15_p3) target bundleno = 3 (0x3), region = 75 }
 0x303   :  { %1411 = vsyncpa [#allocation3], 1 }
 0x304   :  { %1413 = vsyncpa [#allocation3 + $0x1], 1 }

</bundles_post_ra>
